<compile_context>
chip_gen: v6e
topology: v6e:2x2x1
jax: 0.10.0
libtpu: 0.0.40
codegen_flags: <defaults>
</compile_context>

<pallas_src>
import math

import jax
import jax.numpy as jnp
from jax.experimental import pallas as pl
from jax.experimental.pallas import tpu as pltpu


def _round_up(x, m):
    return ((x + m - 1) // m) * m


def _tpu_caps():
    """Per-generation (tm_cap, num_tensorcores, vmem_budget_bytes)."""
    kind = ""
    try:
        kind = jax.devices()[0].device_kind.lower()
    except Exception:
        pass
    if "v7" in kind:
        # 2 TCs/chip, 64 MiB VMEM per TC, 2x256 MXU.
        return 256, 2, int(64 * 1024 * 1024 * 0.70)
    if "v6" in kind:
        # 1 TC, 128 MiB VMEM, 2x256 MXU.
        return 256, 1, int(128 * 1024 * 1024 * 0.70)
    if "v5 lite" in kind or "v5e" in kind or "v5litepod" in kind:
        # 1 TC, 128 MiB VMEM, 4x128 MXU.
        return 128, 1, int(128 * 1024 * 1024 * 0.70)
    # Unknown / older: conservative defaults.
    return 128, 1, int(64 * 1024 * 1024 * 0.70)


def _tile_vmem_bytes(tm, tn, input_dim, latent_dim, x_itemsize, out_itemsize):
    """Estimated VMEM use: every in/out block is double-buffered by the pipeline."""
    x_blk = tm * input_dim * x_itemsize * 2          # x batch tile (resident index)
    we_blk = input_dim * latent_dim * 2 * 2          # bf16 encoder weight (resident)
    be_blk = latent_dim * 4 * 2                      # encoder bias
    wd_blk = latent_dim * tn * 2 * 2                 # bf16 decoder weight column tile
    bd_blk = tn * 4 * 2                              # decoder bias column tile
    o_blk = tm * tn * out_itemsize * 2               # output tile
    z_scr = tm * latent_dim * 4                      # latent scratch (single buffer)
    return x_blk + we_blk + be_blk + wd_blk + bd_blk + o_blk + z_scr


def _pick_tile_n(input_dim, tm, latent_dim, x_itemsize, out_itemsize, budget):
    """Largest lane-dense (128-multiple) output-column tile that fits the VMEM budget.

    Prefers tn == input_dim (grid collapses to one column step) when it fits.
    """
    if input_dim % 128 != 0:
        # TODO(synk): pad decoder output columns to a 128 multiple for lane-dense
        # stores instead of a single lane-sparse full-width tile.
        return input_dim
    candidates = [input_dim] + [t for t in (4096, 2048, 1024, 512, 256, 128)
                                if t < input_dim and input_dim % t == 0]
    for tn in candidates:
        if _tile_vmem_bytes(tm, tn, input_dim, latent_dim, x_itemsize, out_itemsize) <= budget:
            return tn
    return 128  # smallest lane-dense tile; see TODO above for K-streaming fallback


def _autoencoder_kernel(x_ref, we_ref, be_ref, wd_ref, bd_ref, out_ref, z_ref):
    # x_ref:  (TM, input_dim)  activations (batch tile)
    # we_ref: (input_dim, L)   bf16 encoder weight, (in, out) layout
    # be_ref: (1, L)           f32 encoder bias
    # wd_ref: (L, TN)          bf16 decoder weight column tile, (in, out) layout
    # bd_ref: (1, TN)          f32 decoder bias tile
    # out_ref:(TM, TN)         lane-dense reconstruction tile
    # z_ref:  (TM, L)          f32 VMEM scratch: latent for this batch tile

    # Encoder: compute z once per batch tile (first column step only).
    @pl.when(pl.program_id(1) == 0)
    def _():
        xb = x_ref[...].astype(jnp.bfloat16)                      # bf16 MXU operands
        z = jnp.dot(xb, we_ref[...], preferred_element_type=jnp.float32)
        z_ref[...] = z + be_ref[...]                              # f32 epilogue

    # Decoder: one lane-dense column tile of the reconstruction.
    zb = z_ref[...].astype(jnp.bfloat16)
    y = jnp.dot(zb, wd_ref[...], preferred_element_type=jnp.float32)
    y = y + bd_ref[...]
    out_ref[...] = jax.nn.sigmoid(y).astype(out_ref.dtype)


def prepare_params(w_enc, b_enc, w_dec, b_dec):
    """One-time parameter prep (NOT per forward call).

    w_enc: (latent, input_dim), b_enc: (latent,)   -- PyTorch nn.Linear (out, in)
    w_dec: (input_dim, latent), b_dec: (input_dim,)
    Returns (we_t, be2d, wd_t, bd2d) with weights in (in, out) layout, bf16.
    """
    latent_dim = w_enc.shape[0]
    input_dim = w_dec.shape[0]
    we_t = jnp.asarray(w_enc.T, dtype=jnp.bfloat16)            # (input_dim, latent)
    wd_t = jnp.asarray(w_dec.T, dtype=jnp.bfloat16)            # (latent, input_dim)
    be2d = jnp.asarray(b_enc, dtype=jnp.float32).reshape(1, latent_dim)
    bd2d = jnp.asarray(b_dec, dtype=jnp.float32).reshape(1, input_dim)
    return we_t, be2d, wd_t, bd2d


def linear_autoencoder_forward(x, we_t, be2d, wd_t, bd2d, out_dtype=None):
    """x: (B, C, D, H, W). Returns the reconstruction with the same shape.

    out_dtype: optional override (e.g. jnp.bfloat16) to cut HBM write traffic
    when downstream consumers tolerate it; defaults to x.dtype (module semantics).
    """
    B = x.shape[0]
    input_shape = x.shape[1:]
    input_dim, latent_dim = we_t.shape
    assert math.prod(input_shape) == input_dim, "input shape / weight mismatch"
    out_dtype = x.dtype if out_dtype is None else out_dtype

    x2d = x.reshape(B, input_dim)                               # nn.Flatten (row-major)

    tm_cap, num_tc, vmem_budget = _tpu_caps()
    x_isz = jnp.dtype(x.dtype).itemsize
    o_isz = jnp.dtype(out_dtype).itemsize

    # --- batch tiling: multiple of 16 rows (bf16 LHS packing), per-gen cap ---
    bp0 = _round_up(B, 16)
    tm = min(tm_cap, bp0)
    # v7x: if the whole batch would be one tile, split it so both TensorCores
    # get a batch tile via the "parallel" m axis.
    if num_tc >= 2 and bp0 <= tm_cap and bp0 >= 32:
        tm = _round_up((bp0 + 1) // 2, 16)
    # Shrink tm if the resident x / W_enc blocks would exceed the VMEM budget.
    while tm > 16 and _tile_vmem_bytes(tm, min(128, input_dim), input_dim,
                                       latent_dim, x_isz, o_isz) > vmem_budget:
        tm = max(16, ((tm // 2) // 16) * 16)
    bp = _round_up(B, tm)
    nm = bp // tm
    if bp != B:
        x2d = jnp.pad(x2d, ((0, bp - B), (0, 0)))

    # --- decoder output-column tiling: as wide as the VMEM budget allows ---
    tn = _pick_tile_n(input_dim, tm, latent_dim, x_isz, o_isz, vmem_budget)
    n_col = input_dim // tn

    vmem_needed = _tile_vmem_bytes(tm, tn, input_dim, latent_dim, x_isz, o_isz)
    vmem_limit = int(min(vmem_budget, max(2 * vmem_needed, 32 * 1024 * 1024)))

    # Deeper pipelining on the small, latency-bound W_dec / b_dec column stream
    # only when there are enough column steps to benefit.
    if n_col >= 3:
        wd_spec = pl.BlockSpec((latent_dim, tn), lambda m, n: (0, n),
                               pipeline_mode=pl.Buffered(3))
        bd_spec = pl.BlockSpec((1, tn), lambda m, n: (0, n),
                               pipeline_mode=pl.Buffered(3))
    else:
        wd_spec = pl.BlockSpec((latent_dim, tn), lambda m, n: (0, n))
        bd_spec = pl.BlockSpec((1, tn), lambda m, n: (0, n))

    out2d = pl.pallas_call(
        _autoencoder_kernel,
        out_shape=jax.ShapeDtypeStruct((bp, input_dim), out_dtype),
        grid=(nm, n_col),
        in_specs=[
            pl.BlockSpec((tm, input_dim), lambda m, n: (m, 0)),           # x batch tile
            pl.BlockSpec((input_dim, latent_dim), lambda m, n: (0, 0)),   # W_enc (resident)
            pl.BlockSpec((1, latent_dim), lambda m, n: (0, 0)),           # b_enc
            wd_spec,                                                      # W_dec column tile
            bd_spec,                                                      # b_dec column tile
        ],
        out_specs=pl.BlockSpec((tm, tn), lambda m, n: (m, n)),
        scratch_shapes=[pltpu.VMEM((tm, latent_dim), jnp.float32)],       # latent z
        compiler_params=pltpu.CompilerParams(
            dimension_semantics=("parallel", "arbitrary"),
            vmem_limit_bytes=vmem_limit,
        ),
    )(x2d, we_t, be2d, wd_t, bd2d)

    if bp != B:
        out2d = out2d[:B]
    return out2d.reshape(B, *input_shape)                        # .view(batch, *input_shape)


def _init_linear_params(key, out_features, in_features):
    """Deterministic PyTorch-style Linear init: U(-1/sqrt(fan_in), 1/sqrt(fan_in))."""
    kw, kb = jax.random.split(key)
    bound = 1.0 / jnp.sqrt(jnp.float32(in_features))
    w = jax.random.uniform(kw, (out_features, in_features), jnp.float32, -bound, bound)
    b = jax.random.uniform(kb, (out_features,), jnp.float32, -bound, bound)
    return w, b


if __name__ == "__main__":
    # Small shapes consistent with the module: input_shape (C, D, H, W), latent_dim.
    B = 16
    C, D, H, W = 4, 8, 8, 8          # input_dim = 4*8*8*8 = 2048
    LATENT = 32
    INPUT_DIM = C * D * H * W

    root = jax.random.PRNGKey(0)
    k_x, k_enc, k_dec = jax.random.split(root, 3)

    x = jax.random.uniform(k_x, (B, C, D, H, W), jnp.float32)   # lesion-mask-like input in [0,1)

    w_enc, b_enc = _init_linear_params(k_enc, LATENT, INPUT_DIM)   # nn.Linear(input_dim, latent)
    w_dec, b_dec = _init_linear_params(k_dec, INPUT_DIM, LATENT)   # nn.Linear(latent, input_dim)

    # Parameter prep happens ONCE (transpose + bf16 cast), not per forward.
    params = prepare_params(w_enc, b_enc, w_dec, b_dec)

    recon = linear_autoencoder_forward(x, *params)
    recon = jax.block_until_ready(recon)

    # Reference in full f32 (module semantics). bf16 MXU operands => relaxed tolerance.
    z_ref = x.reshape(B, INPUT_DIM) @ w_enc.T + b_enc
    y_ref = jax.nn.sigmoid(z_ref @ w_dec.T + b_dec).reshape(B, C, D, H, W)
    assert recon.shape == (B, C, D, H, W)
    assert recon.dtype == x.dtype
    max_err = float(jnp.max(jnp.abs(recon.astype(jnp.float32) - y_ref)))
    assert max_err < 1e-2, f"max abs err {max_err}"

    print("KERNEL_OK")
</pallas_src>

<mosaic_0001>
module attributes {stable_mosaic.version = 11 : i64} {
  func.func @_autoencoder_kernel(%arg0: i32, %arg1: i32, %arg2: memref<16x2048xf32, #tpu.memory_space<vmem>>, %arg3: memref<2048x32xbf16, #tpu.memory_space<vmem>>, %arg4: memref<1x32xf32, #tpu.memory_space<vmem>>, %arg5: memref<32x2048xbf16, #tpu.memory_space<vmem>>, %arg6: memref<1x2048xf32, #tpu.memory_space<vmem>>, %arg7: memref<16x2048xf32, #tpu.memory_space<vmem>>, %arg8: memref<16x32xf32, #tpu.memory_space<vmem>>) attributes {dimension_semantics = [#tpu.dimension_semantics<parallel>, #tpu.dimension_semantics<arbitrary>], iteration_bounds = array<i64: 1, 1>, scalar_prefetch = 0 : i64, scratch_operands = 1 : i64, tpu.core_type = #tpu.core_type<tc>, window_params = [{transform_indices = @transform_0, window_bounds = array<i64: 16, 2048>}, {pipeline_mode = #tpu.pipeline_mode<synchronous>, transform_indices = @transform_1, window_bounds = array<i64: 2048, 32>}, {pipeline_mode = #tpu.pipeline_mode<synchronous>, transform_indices = @transform_2, window_bounds = array<i64: 1, 32>}, {transform_indices = @transform_3, window_bounds = array<i64: 32, 2048>}, {transform_indices = @transform_4, window_bounds = array<i64: 1, 2048>}, {transform_indices = @transform_5, window_bounds = array<i64: 16, 2048>}]} {
    %c0_i32 = arith.constant 0 : i32
    %0 = arith.cmpi eq, %arg1, %c0_i32 : i32
    %1 = arith.extui %0 : i1 to i32
    %c0_i32_0 = arith.constant 0 : i32
    %2 = arith.cmpi ne, %1, %c0_i32_0 : i32
    scf.if %2 {
      %c0_9 = arith.constant 0 : index
      %c0_10 = arith.constant 0 : index
      %16 = vector.load %arg2[%c0_9, %c0_10] : memref<16x2048xf32, #tpu.memory_space<vmem>>, vector<16x2048xf32>
      %17 = arith.truncf %16 : vector<16x2048xf32> to vector<16x2048xbf16>
      %c0_11 = arith.constant 0 : index
      %c0_12 = arith.constant 0 : index
      %18 = vector.load %arg3[%c0_11, %c0_12] : memref<2048x32xbf16, #tpu.memory_space<vmem>>, vector<2048x32xbf16>
      %cst_13 = arith.constant dense<0.000000e+00> : vector<16x32xf32>
      %19 = tpu.matmul %17, %18, %cst_13 {dimension_numbers = #tpu.dot_dimension_numbers<[1], [0], [0], [1], [0, 0, 1, 1], [], []>} : vector<16x2048xbf16>, vector<2048x32xbf16>, vector<16x32xf32> -> vector<16x32xf32>
      %c0_14 = arith.constant 0 : index
      %c0_15 = arith.constant 0 : index
      %20 = vector.load %arg4[%c0_14, %c0_15] : memref<1x32xf32, #tpu.memory_space<vmem>>, vector<1x32xf32>
      %21 = vector.broadcast %20 : vector<1x32xf32> to vector<16x32xf32>
      %22 = arith.addf %19, %21 : vector<16x32xf32>
      %c0_16 = arith.constant 0 : index
      %c0_17 = arith.constant 0 : index
      %23 = vector.load %arg8[%c0_16, %c0_17] : memref<16x32xf32, #tpu.memory_space<vmem>>, vector<16x32xf32>
      tpu.vector_store %arg8[%c0_16, %c0_17], %22 {strides = array<i32>} : memref<16x32xf32, #tpu.memory_space<vmem>>, vector<16x32xf32>,
    } else {
    }
    %c0 = arith.constant 0 : index
    %c0_1 = arith.constant 0 : index
    %3 = vector.load %arg8[%c0, %c0_1] : memref<16x32xf32, #tpu.memory_space<vmem>>, vector<16x32xf32>
    %4 = arith.truncf %3 : vector<16x32xf32> to vector<16x32xbf16>
    %c0_2 = arith.constant 0 : index
    %c0_3 = arith.constant 0 : index
    %5 = vector.load %arg5[%c0_2, %c0_3] : memref<32x2048xbf16, #tpu.memory_space<vmem>>, vector<32x2048xbf16>
    %cst = arith.constant dense<0.000000e+00> : vector<16x2048xf32>
    %6 = tpu.matmul %4, %5, %cst {dimension_numbers = #tpu.dot_dimension_numbers<[1], [0], [0], [1], [0, 0, 1, 1], [], []>} : vector<16x32xbf16>, vector<32x2048xbf16>, vector<16x2048xf32> -> vector<16x2048xf32>
    %c0_4 = arith.constant 0 : index
    %c0_5 = arith.constant 0 : index
    %7 = vector.load %arg6[%c0_4, %c0_5] : memref<1x2048xf32, #tpu.memory_space<vmem>>, vector<1x2048xf32>
    %8 = vector.broadcast %7 : vector<1x2048xf32> to vector<16x2048xf32>
    %9 = arith.addf %6, %8 : vector<16x2048xf32>
    %10 = arith.negf %9 : vector<16x2048xf32>
    %11 = math.exp %10 : vector<16x2048xf32>
    %cst_6 = arith.constant 1.000000e+00 : f32
    %12 = vector.broadcast %cst_6 : f32 to vector<16x2048xf32>
    %13 = arith.addf %12, %11 : vector<16x2048xf32>
    %14 = arith.divf %12, %13 : vector<16x2048xf32>
    %c0_7 = arith.constant 0 : index
    %c0_8 = arith.constant 0 : index
    %15 = vector.load %arg7[%c0_7, %c0_8] : memref<16x2048xf32, #tpu.memory_space<vmem>>, vector<16x2048xf32>
    tpu.vector_store %arg7[%c0_7, %c0_8], %14 {strides = array<i32>} : memref<16x2048xf32, #tpu.memory_space<vmem>>, vector<16x2048xf32>,
    return
  }
  func.func @transform_0(%arg0: i32, %arg1: i32) -> (i32, i32) {
    %c0_i32 = arith.constant 0 : i32
    %c0_i32_0 = arith.constant 0 : i32
    return %arg0, %c0_i32 : i32, i32
  }
  func.func @transform_1(%arg0: i32, %arg1: i32) -> (i32, i32) {
    %c0_i32 = arith.constant 0 : i32
    %c0_i32_0 = arith.constant 0 : i32
    %c0_i32_1 = arith.constant 0 : i32
    return %c0_i32, %c0_i32_0 : i32, i32
  }
  func.func @transform_2(%arg0: i32, %arg1: i32) -> (i32, i32) {
    %c0_i32 = arith.constant 0 : i32
    %c0_i32_0 = arith.constant 0 : i32
    %c0_i32_1 = arith.constant 0 : i32
    return %c0_i32, %c0_i32_0 : i32, i32
  }
  func.func @transform_3(%arg0: i32, %arg1: i32) -> (i32, i32) {
    %c0_i32 = arith.constant 0 : i32
    %c0_i32_0 = arith.constant 0 : i32
    return %c0_i32, %arg1 : i32, i32
  }
  func.func @transform_4(%arg0: i32, %arg1: i32) -> (i32, i32) {
    %c0_i32 = arith.constant 0 : i32
    %c0_i32_0 = arith.constant 0 : i32
    return %c0_i32, %arg1 : i32, i32
  }
  func.func @transform_5(%arg0: i32, %arg1: i32) -> (i32, i32) {
    %c0_i32 = arith.constant 0 : i32
    return %arg0, %arg1 : i32, i32
  }
}

</mosaic_0001>

<bundles_post_ra>
// kernel: tpu_custom_call.1
= control target key start
LH: loop header
LB: loop body
LE: loop exit
PB: predicated region body
PF: predicated region fallthrough
CT: control target
= control target key end

     0   :  { %s3686_s0 = inlined_call_operand.vmem [shape: f32[16,2048], index: 0, kind: input, shape index: {}]   ;;  %s3687_s1 = inlined_call_operand.vmem [shape: bf16[2048,32], index: 1, kind: input, shape index: {}]   ;;  %s3688_s2 = inlined_call_operand.vmem [shape: f32[1,32], index: 2, kind: input, shape index: {}]   ;;  %s3689_s3 = inlined_call_operand.vmem [shape: bf16[32,2048], index: 3, kind: input, shape index: {}]   ;;  %s3690_s4 = inlined_call_operand.vmem [shape: f32[1,2048], index: 4, kind: input, shape index: {}]   ;;  %s3691_s5 = inlined_call_operand.hbm [shape: f32[16,2048], index: 5, kind: output, shape index: {}]  }
   0x1   :  { %v2684_v0 = vld [vmem:[%s3687_s1 + $0x78] sm:$0xff]   ;;  %v2688_v4 = vld [vmem:[%s3687_s1 + $0x70] sm:$0xff]   ;;  %v2692_v8 = vld [vmem:[%s3687_s1 + $0x68] sm:$0xff]  }
   0x2   :  { %v2685_v1 = vld [vmem:[%s3687_s1 + $0xf8] sm:$0xff]   ;;  %2504 = vmatprep.subr.bf16.mxu0 %v2684_v0  ;;  %v2689_v5 = vld [vmem:[%s3687_s1 + $0xf0] sm:$0xff]   ;;  %v2693_v9 = vld [vmem:[%s3687_s1 + $0xe8] sm:$0xff]  }
   0x3   :  { %v2686_v2 = vld [vmem:[%s3687_s1 + $0x38] sm:$0xff]   ;;  %2526 = vmatprep.subr.bf16.mxu1 %v2685_v1  ;;  %v2690_v6 = vld [vmem:[%s3687_s1 + $0x30] sm:$0xff]   ;;  %v2694_v10 = vld [vmem:[%s3687_s1 + $0x28] sm:$0xff]  }
   0x4   :  { %v2687_v3 = vld [vmem:[%s3687_s1 + $0xb8] sm:$0xff]   ;;  %2505 = vmatpush3.bf16.msra.mxu0 %v2686_v2  ;;  %v2691_v7 = vld [vmem:[%s3687_s1 + $0xb0] sm:$0xff]   ;;  %v2695_v11 = vld [vmem:[%s3687_s1 + $0xa8] sm:$0xff]  }
   0x5   :  { %2527 = vmatpush3.bf16.msra.mxu1 %v2687_v3  ;;  %2506 = vmatprep.subr.bf16.mxu0 %v2688_v4  ;;  %v2696_v12 = vld [vmem:[%s3687_s1 + $0x60] sm:$0xff]   ;;  %v2700_v16 = vld [vmem:[%s3687_s1 + $0x58] sm:$0xff]   ;;  %v2704_v20 = vld [vmem:[%s3687_s1 + $0x50] sm:$0xff]  }
   0x6   :  { %2528 = vmatprep.subr.bf16.mxu1 %v2689_v5  ;;  %v2697_v13 = vld [vmem:[%s3687_s1 + $0xe0] sm:$0xff]   ;;  %v2701_v17 = vld [vmem:[%s3687_s1 + $0xd8] sm:$0xff]   ;;  %v2705_v21 = vld [vmem:[%s3687_s1 + $0xd0] sm:$0xff]  }
   0x7   :  { %v2698_v14 = vld [vmem:[%s3687_s1 + $0x20] sm:$0xff]   ;;  %v2702_v18 = vld [vmem:[%s3687_s1 + $0x18] sm:$0xff]   ;;  %v2706_v22 = vld [vmem:[%s3687_s1 + $0x10] sm:$0xff]  }
   0x8   :  { %2507 = vmatpush3.bf16.msra.mxu0 %v2690_v6  ;;  %v2699_v15 = vld [vmem:[%s3687_s1 + $0xa0] sm:$0xff]   ;;  %v2703_v19 = vld [vmem:[%s3687_s1 + $0x98] sm:$0xff]   ;;  %v2707_v23 = vld [vmem:[%s3687_s1 + $0x90] sm:$0xff]  }
   0x9   :  { %2529 = vmatpush3.bf16.msra.mxu1 %v2691_v7  ;;  %2508 = vmatprep.subr.bf16.mxu0 %v2692_v8  ;;  %v2708_v24 = vld [vmem:[%s3687_s1 + $0x48] sm:$0xff]   ;;  %v2712_v28 = vld [vmem:[%s3687_s1 + $0x40] sm:$0xff]   ;;  %v29_v34 = vld [vmem:[%s3686_s0 + $0x18] sm:$0xff] }
   0xa   :  { %2530 = vmatprep.subr.bf16.mxu1 %v2693_v9  ;;  %v2709_v25 = vld [vmem:[%s3687_s1 + $0xc8] sm:$0xff]   ;;  %v2713_v29 = vld [vmem:[%s3687_s1 + $0xc0] sm:$0xff]   ;;  %v45_v36 = vld [vmem:[%s3686_s0 + $0x98] sm:$0xff] }
   0xb   :  { %v2710_v26 = vld [vmem:[%s3687_s1 + $0x8] sm:$0xff]   ;;  %v2714_v30 = vld [vmem:[%s3687_s1] sm:$0xff]   ;;  %v61_v39 = vpack.c.bf16 %v45_v36, %v29_v34  ;;  %v28_v41 = vld [vmem:[%s3686_s0 + $0x10] sm:$0xff] }
   0xc   :  { %2509 = vmatpush3.bf16.msra.mxu0 %v2694_v10  ;;  %v2711_v27 = vld [vmem:[%s3687_s1 + $0x88] sm:$0xff]   ;;  %v2715_v31 = vld [vmem:[%s3687_s1 + $0x80] sm:$0xff]   ;;  %v44_v42 = vld [vmem:[%s3686_s0 + $0x90] sm:$0xff] }
   0xd   :  { %2531 = vmatpush3.bf16.msra.mxu1 %v2695_v11  ;;  %2510 = vmatprep.subr.bf16.mxu0 %v2696_v12  ;;  %v27_v32 = vld [vmem:[%s3686_s0 + $0x8] sm:$0xff]  ;;  %v26_v37 = vld [vmem:[%s3686_s0] sm:$0xff]  ;;  %v60_v43 = vpack.c.bf16 %v44_v42, %v28_v41  ;;  %v2716_v44 = vld [vmem:[%s3687_s1 + $0x178] sm:$0xff]  }
   0xe   :  { %2532 = vmatprep.subr.bf16.mxu1 %v2697_v13  ;;  %v43_v33 = vld [vmem:[%s3686_s0 + $0x88] sm:$0xff]  ;;  %v42_v38 = vld [vmem:[%s3686_s0 + $0x80] sm:$0xff]  ;;  %1178 = vmatprep.mubr.bf16.mxu1 %v61_v39  ;;  %v2717_v45 = vld [vmem:[%s3687_s1 + $0x1f8] sm:$0xff]  }
   0xf   :  { %v59_v35 = vpack.c.bf16 %v43_v33, %v27_v32  ;;  %v58_v40 = vpack.c.bf16 %v42_v38, %v26_v37  ;;  %v2718_v46 = vld [vmem:[%s3687_s1 + $0x138] sm:$0xff]   ;;  %v2720_v48 = vld [vmem:[%s3687_s1 + $0x170] sm:$0xff]   ;;  %v2724_v52 = vld [vmem:[%s3687_s1 + $0x168] sm:$0xff]  }
  0x10   :  { %2511 = vmatpush3.bf16.msra.mxu0 %v2698_v14  ;;  %v2719_v47 = vld [vmem:[%s3687_s1 + $0x1b8] sm:$0xff]   ;;  %v2721_v49 = vld [vmem:[%s3687_s1 + $0x1f0] sm:$0xff]   ;;  %v2725_v53 = vld [vmem:[%s3687_s1 + $0x1e8] sm:$0xff]  }
  0x11   :  { %2533 = vmatpush3.bf16.msra.mxu1 %v2699_v15  ;;  %2512 = vmatprep.subr.bf16.mxu0 %v2700_v16  ;;  %v2722_v50 = vld [vmem:[%s3687_s1 + $0x130] sm:$0xff]   ;;  %v2726_v54 = vld [vmem:[%s3687_s1 + $0x128] sm:$0xff]   ;;  %v2728_v56 = vld [vmem:[%s3687_s1 + $0x160] sm:$0xff]  }
  0x12   :  { %2534 = vmatprep.subr.bf16.mxu1 %v2701_v17  ;;  %1137 = vmatprep.mubr.bf16.mxu0 %v59_v35  ;;  %v2723_v51 = vld [vmem:[%s3687_s1 + $0x1b0] sm:$0xff]   ;;  %v2727_v55 = vld [vmem:[%s3687_s1 + $0x1a8] sm:$0xff]   ;;  %v2729_v57 = vld [vmem:[%s3687_s1 + $0x1e0] sm:$0xff]  }
  0x13   :  { %v2730_v58 = vld [vmem:[%s3687_s1 + $0x120] sm:$0xff]   ;;  %v2732_v60 = vld [vmem:[%s3687_s1 + $0x158] sm:$0xff]   ;;  %v2736_v0 = vld [vmem:[%s3687_s1 + $0x150] sm:$0xff]  }
  0x14   :  { %2513 = vmatpush3.bf16.msra.mxu0 %v2702_v18  ;;  %v2731_v59 = vld [vmem:[%s3687_s1 + $0x1a0] sm:$0xff]   ;;  %v2733_v61 = vld [vmem:[%s3687_s1 + $0x1d8] sm:$0xff]   ;;  %v2737_v1 = vld [vmem:[%s3687_s1 + $0x1d0] sm:$0xff]  }
  0x15   :  { %2535 = vmatpush3.bf16.msra.mxu1 %v2703_v19  ;;  %2514 = vmatprep.subr.bf16.mxu0 %v2704_v20  ;;  %v2734_v62 = vld [vmem:[%s3687_s1 + $0x118] sm:$0xff]   ;;  %v2738_v2 = vld [vmem:[%s3687_s1 + $0x110] sm:$0xff]   ;;  %v2740_v4 = vld [vmem:[%s3687_s1 + $0x148] sm:$0xff]  }
  0x16   :  { %2536 = vmatprep.subr.bf16.mxu1 %v2705_v21  ;;  %v2735_v63 = vld [vmem:[%s3687_s1 + $0x198] sm:$0xff]   ;;  %v2739_v3 = vld [vmem:[%s3687_s1 + $0x190] sm:$0xff]   ;;  %v2741_v5 = vld [vmem:[%s3687_s1 + $0x1c8] sm:$0xff]  }
  0x17   :  { %v2742_v6 = vld [vmem:[%s3687_s1 + $0x108] sm:$0xff]   ;;  %v2744_v8 = vld [vmem:[%s3687_s1 + $0x140] sm:$0xff]   ;;  %v33_v14 = vld [vmem:[%s3686_s0 + $0x38] sm:$0xff] }
  0x18   :  { %2515 = vmatpush3.bf16.msra.mxu0 %v2706_v22  ;;  %v2743_v7 = vld [vmem:[%s3687_s1 + $0x188] sm:$0xff]   ;;  %v2745_v9 = vld [vmem:[%s3687_s1 + $0x1c0] sm:$0xff]   ;;  %v49_v15 = vld [vmem:[%s3686_s0 + $0xb8] sm:$0xff] }
  0x19   :  { %2537 = vmatpush3.bf16.msra.mxu1 %v2707_v23  ;;  %2516 = vmatprep.subr.bf16.mxu0 %v2708_v24  ;;  %v2746_v10 = vld [vmem:[%s3687_s1 + $0x100] sm:$0xff]   ;;  %v31_v12 = vld [vmem:[%s3686_s0 + $0x28] sm:$0xff]  ;;  %v65_v17 = vpack.c.bf16 %v49_v15, %v33_v14  ;;  %v32_v20 = vld [vmem:[%s3686_s0 + $0x30] sm:$0xff] }
  0x1a   :  { %2538 = vmatprep.subr.bf16.mxu1 %v2709_v25  ;;  %v2747_v11 = vld [vmem:[%s3687_s1 + $0x180] sm:$0xff]   ;;  %v47_v13 = vld [vmem:[%s3686_s0 + $0xa8] sm:$0xff]  ;;  %v48_v22 = vld [vmem:[%s3686_s0 + $0xb0] sm:$0xff] }
  0x1b   :  { %v63_v16 = vpack.c.bf16 %v47_v13, %v31_v12  ;;  %v30_v18 = vld [vmem:[%s3686_s0 + $0x20] sm:$0xff]  ;;  %v64_v23 = vpack.c.bf16 %v48_v22, %v32_v20  ;;  %v2748_v24 = vld [vmem:[%s3687_s1 + $0x278] sm:$0xff]   ;;  %v2756_v32 = vld [vmem:[%s3687_s1 + $0x268] sm:$0xff]  }
  0x1c   :  { %2517 = vmatpush3.bf16.msra.mxu0 %v2710_v26  ;;  %v46_v19 = vld [vmem:[%s3686_s0 + $0xa0] sm:$0xff]  ;;  %v2749_v25 = vld [vmem:[%s3687_s1 + $0x2f8] sm:$0xff]   ;;  %v2757_v33 = vld [vmem:[%s3687_s1 + $0x2e8] sm:$0xff]  }
  0x1d   :  { %2539 = vmatpush3.bf16.msra.mxu1 %v2711_v27  ;;  %2518 = vmatprep.subr.bf16.mxu0 %v2712_v28  ;;  %v62_v21 = vpack.c.bf16 %v46_v19, %v30_v18  ;;  %v2750_v26 = vld [vmem:[%s3687_s1 + $0x238] sm:$0xff]   ;;  %v2752_v28 = vld [vmem:[%s3687_s1 + $0x270] sm:$0xff]   ;;  %v2758_v34 = vld [vmem:[%s3687_s1 + $0x228] sm:$0xff]  }
  0x1e   :  { %2540 = vmatprep.subr.bf16.mxu1 %v2713_v29  ;;  %v2751_v27 = vld [vmem:[%s3687_s1 + $0x2b8] sm:$0xff]   ;;  %v2753_v29 = vld [vmem:[%s3687_s1 + $0x2f0] sm:$0xff]   ;;  %v2759_v35 = vld [vmem:[%s3687_s1 + $0x2a8] sm:$0xff]  }
  0x1f   :  { %v2760_v36 = vld [vmem:[%s3687_s1 + $0x260] sm:$0xff]   ;;  %v2765_v41 = vld [vmem:[%s3687_s1 + $0x2d8] sm:$0xff]   ;;  %v2788_v12 = vld [vmem:[%s3687_s1 + $0x368] sm:$0xff]  }
  0x20   :  { %2519 = vmatpush3.bf16.msra.mxu0 %v2714_v30  ;;  %v2754_v30 = vld [vmem:[%s3687_s1 + $0x230] sm:$0xff]   ;;  %v2761_v37 = vld [vmem:[%s3687_s1 + $0x2e0] sm:$0xff]   ;;  %v2766_v42 = vld [vmem:[%s3687_s1 + $0x218] sm:$0xff]  }
  0x21   :  { %2541 = vmatpush3.bf16.msra.mxu1 %v2715_v31  ;;  %2548 = vmatprep.subr.bf16.mxu0 %v2716_v44  ;;  %v2755_v31 = vld [vmem:[%s3687_s1 + $0x2b0] sm:$0xff]   ;;  %v2762_v38 = vld [vmem:[%s3687_s1 + $0x220] sm:$0xff]   ;;  %v2789_v13 = vld [vmem:[%s3687_s1 + $0x3e8] sm:$0xff]  }
  0x22   :  { %2570 = vmatprep.subr.bf16.mxu1 %v2717_v45  ;;  %v2763_v39 = vld [vmem:[%s3687_s1 + $0x2a0] sm:$0xff]   ;;  %v2768_v44 = vld [vmem:[%s3687_s1 + $0x250] sm:$0xff]   ;;  %v2790_v14 = vld [vmem:[%s3687_s1 + $0x328] sm:$0xff]  }
  0x23   :  { %1138 = vmatmul.mubr.bf16.vlgmr.msra.gmra.mxu0 %v58_v40  ;;  %v2764_v40 = vld [vmem:[%s3687_s1 + $0x258] sm:$0xff]   ;;  %v2769_v45 = vld [vmem:[%s3687_s1 + $0x2d0] sm:$0xff]   ;;  %v2791_v15 = vld [vmem:[%s3687_s1 + $0x3a8] sm:$0xff]  }
  0x24   :  { %1179 = vmatmul.mubr.bf16.vlgmr.msra.gmra.mxu1 %v60_v43  ;;  %2549 = vmatpush3.bf16.msra.mxu0 %v2718_v46  ;;  %v2767_v43 = vld [vmem:[%s3687_s1 + $0x298] sm:$0xff]   ;;  %v2770_v46 = vld [vmem:[%s3687_s1 + $0x210] sm:$0xff]   ;;  %v2794_v18 = vld [vmem:[%s3687_s1 + $0x320] sm:$0xff]  }
  0x25   :  { %2571 = vmatpush3.bf16.msra.mxu1 %v2719_v47  ;;  %2550 = vmatprep.subr.bf16.mxu0 %v2720_v48  ;;  %v2771_v47 = vld [vmem:[%s3687_s1 + $0x290] sm:$0xff]   ;;  %v2772_v48 = vld [vmem:[%s3687_s1 + $0x248] sm:$0xff]   ;;  %v2795_v19 = vld [vmem:[%s3687_s1 + $0x3a0] sm:$0xff]  }
  0x26   :  { %2572 = vmatprep.subr.bf16.mxu1 %v2721_v49  ;;  %1219 = vmatprep.mubr.bf16.mxu0 %v63_v16  ;;  %v2773_v49 = vld [vmem:[%s3687_s1 + $0x2c8] sm:$0xff]   ;;  %v2792_v16 = vld [vmem:[%s3687_s1 + $0x360] sm:$0xff]   ;;  %v2796_v20 = vld [vmem:[%s3687_s1 + $0x358] sm:$0xff]  }
  0x27   :  { %1260 = vmatprep.mubr.bf16.mxu1 %v65_v17  ;;  %v2793_v17 = vld [vmem:[%s3687_s1 + $0x3e0] sm:$0xff]   ;;  %v2798_v22 = vld [vmem:[%s3687_s1 + $0x318] sm:$0xff]  }
  0x28   :  { %2551 = vmatpush3.bf16.msra.mxu0 %v2722_v50  ;;  %v2774_v50 = vld [vmem:[%s3687_s1 + $0x208] sm:$0xff]  }
  0x29   :  { %2573 = vmatpush3.bf16.msra.mxu1 %v2723_v51  ;;  %2552 = vmatprep.subr.bf16.mxu0 %v2724_v52  ;;  %v2775_v51 = vld [vmem:[%s3687_s1 + $0x288] sm:$0xff]   ;;  %v2776_v52 = vld [vmem:[%s3687_s1 + $0x240] sm:$0xff]  }
  0x2a   :  { %2574 = vmatprep.subr.bf16.mxu1 %v2725_v53  ;;  %v2777_v53 = vld [vmem:[%s3687_s1 + $0x2c0] sm:$0xff]  }
  0x2c   :  { %2553 = vmatpush3.bf16.msra.mxu0 %v2726_v54  ;;  %v2778_v54 = vld [vmem:[%s3687_s1 + $0x200] sm:$0xff]  }
  0x2d   :  { %2575 = vmatpush3.bf16.msra.mxu1 %v2727_v55  ;;  %2554 = vmatprep.subr.bf16.mxu0 %v2728_v56  ;;  %v2779_v55 = vld [vmem:[%s3687_s1 + $0x280] sm:$0xff]   ;;  %v35_v56 = vld [vmem:[%s3686_s0 + $0x48] sm:$0xff] }
  0x2e   :  { %2576 = vmatprep.subr.bf16.mxu1 %v2729_v57  ;;  %v51_v57 = vld [vmem:[%s3686_s0 + $0xc8] sm:$0xff] }
  0x30   :  { %2555 = vmatpush3.bf16.msra.mxu0 %v2730_v58  ;;  %v67_v58 = vpack.c.bf16 %v51_v57, %v35_v56 }
  0x31   :  { %2577 = vmatpush3.bf16.msra.mxu1 %v2731_v59  ;;  %2556 = vmatprep.subr.bf16.mxu0 %v2732_v60  ;;  %v37_v59 = vld [vmem:[%s3686_s0 + $0x58] sm:$0xff] }
  0x32   :  { %2578 = vmatprep.subr.bf16.mxu1 %v2733_v61  ;;  %v53_v60 = vld [vmem:[%s3686_s0 + $0xd8] sm:$0xff]  ;;  %v34_v61 = vld [vmem:[%s3686_s0 + $0x40] sm:$0xff] }
  0x34   :  { %2557 = vmatpush3.bf16.msra.mxu0 %v2734_v62  ;;  %v69_v62 = vpack.c.bf16 %v53_v60, %v37_v59 }
  0x35   :  { %2579 = vmatpush3.bf16.msra.mxu1 %v2735_v63  ;;  %2558 = vmatprep.subr.bf16.mxu0 %v2736_v0  ;;  %v50_v63 = vld [vmem:[%s3686_s0 + $0xc0] sm:$0xff]  ;;  %v36_v0 = vld [vmem:[%s3686_s0 + $0x50] sm:$0xff] }
  0x36   :  { %2580 = vmatprep.subr.bf16.mxu1 %v2737_v1  ;;  %v52_v1 = vld [vmem:[%s3686_s0 + $0xd0] sm:$0xff] }
  0x38   :  { %2559 = vmatpush3.bf16.msra.mxu0 %v2738_v2  ;;  %v66_v2 = vpack.c.bf16 %v50_v63, %v34_v61 }
  0x39   :  { %2581 = vmatpush3.bf16.msra.mxu1 %v2739_v3  ;;  %2560 = vmatprep.subr.bf16.mxu0 %v2740_v4  ;;  %v68_v3 = vpack.c.bf16 %v52_v1, %v36_v0  ;;  %v2780_v4 = vld [vmem:[%s3687_s1 + $0x378] sm:$0xff]  }
  0x3a   :  { %2582 = vmatprep.subr.bf16.mxu1 %v2741_v5  ;;  %v2781_v5 = vld [vmem:[%s3687_s1 + $0x3f8] sm:$0xff]  }
  0x3c   :  { %2561 = vmatpush3.bf16.msra.mxu0 %v2742_v6  ;;  %v2782_v6 = vld [vmem:[%s3687_s1 + $0x338] sm:$0xff]  }
  0x3d   :  { %2583 = vmatpush3.bf16.msra.mxu1 %v2743_v7  ;;  %2562 = vmatprep.subr.bf16.mxu0 %v2744_v8  ;;  %v2783_v7 = vld [vmem:[%s3687_s1 + $0x3b8] sm:$0xff]   ;;  %v2784_v8 = vld [vmem:[%s3687_s1 + $0x370] sm:$0xff]  }
  0x3e   :  { %2584 = vmatprep.subr.bf16.mxu1 %v2745_v9  ;;  %v2785_v9 = vld [vmem:[%s3687_s1 + $0x3f0] sm:$0xff]  }
  0x40   :  { %2563 = vmatpush3.bf16.msra.mxu0 %v2746_v10  ;;  %v2786_v10 = vld [vmem:[%s3687_s1 + $0x330] sm:$0xff]  }
  0x41   :  { %2585 = vmatpush3.bf16.msra.mxu1 %v2747_v11  ;;  %2592 = vmatprep.subr.bf16.mxu0 %v2748_v24  ;;  %v2787_v11 = vld [vmem:[%s3687_s1 + $0x3b0] sm:$0xff]  }
  0x42   :  { %2614 = vmatprep.subr.bf16.mxu1 %v2749_v25  ;;  %v2800_v24 = vld [vmem:[%s3687_s1 + $0x350] sm:$0xff]  }
  0x43   :  { %1220 = vmatmul.mubr.bf16.vlgmr.msra.gmra.mxu0 %v62_v21  ;;  %v2797_v21 = vld [vmem:[%s3687_s1 + $0x3d8] sm:$0xff]   ;;  %v2801_v25 = vld [vmem:[%s3687_s1 + $0x3d0] sm:$0xff]  }
  0x44   :  { %1261 = vmatmul.mubr.bf16.vlgmr.msra.gmra.mxu1 %v64_v23  ;;  %2593 = vmatpush3.bf16.msra.mxu0 %v2750_v26  ;;  %v2799_v23 = vld [vmem:[%s3687_s1 + $0x398] sm:$0xff]   ;;  %v2802_v26 = vld [vmem:[%s3687_s1 + $0x310] sm:$0xff]  }
  0x45   :  { %2615 = vmatpush3.bf16.msra.mxu1 %v2751_v27  ;;  %2594 = vmatprep.subr.bf16.mxu0 %v2752_v28  ;;  %v2803_v27 = vld [vmem:[%s3687_s1 + $0x390] sm:$0xff]   ;;  %v2804_v28 = vld [vmem:[%s3687_s1 + $0x348] sm:$0xff]  }
  0x46   :  { %2616 = vmatprep.subr.bf16.mxu1 %v2753_v29  ;;  %1301 = vmatprep.mubr.bf16.mxu0 %v67_v58  ;;  %v2805_v29 = vld [vmem:[%s3687_s1 + $0x3c8] sm:$0xff]  }
  0x47   :  { %1342 = vmatprep.mubr.bf16.mxu1 %v69_v62 }
  0x48   :  { %2595 = vmatpush3.bf16.msra.mxu0 %v2754_v30  ;;  %v2806_v30 = vld [vmem:[%s3687_s1 + $0x308] sm:$0xff]  }
  0x49   :  { %2617 = vmatpush3.bf16.msra.mxu1 %v2755_v31  ;;  %2596 = vmatprep.subr.bf16.mxu0 %v2756_v32  ;;  %v2807_v31 = vld [vmem:[%s3687_s1 + $0x388] sm:$0xff]   ;;  %v2808_v32 = vld [vmem:[%s3687_s1 + $0x340] sm:$0xff]  }
  0x4a   :  { %2618 = vmatprep.subr.bf16.mxu1 %v2757_v33  ;;  %v2809_v33 = vld [vmem:[%s3687_s1 + $0x3c0] sm:$0xff]  }
  0x4c   :  { %2597 = vmatpush3.bf16.msra.mxu0 %v2758_v34  ;;  %v2810_v34 = vld [vmem:[%s3687_s1 + $0x300] sm:$0xff]  }
  0x4d   :  { %2619 = vmatpush3.bf16.msra.mxu1 %v2759_v35  ;;  %2598 = vmatprep.subr.bf16.mxu0 %v2760_v36  ;;  %v2811_v35 = vld [vmem:[%s3687_s1 + $0x380] sm:$0xff]   ;;  %v39_v36 = vld [vmem:[%s3686_s0 + $0x68] sm:$0xff] }
  0x4e   :  { %2620 = vmatprep.subr.bf16.mxu1 %v2761_v37  ;;  %v55_v37 = vld [vmem:[%s3686_s0 + $0xe8] sm:$0xff] }
  0x50   :  { %2599 = vmatpush3.bf16.msra.mxu0 %v2762_v38  ;;  %v41_v38 = vld [vmem:[%s3686_s0 + $0x78] sm:$0xff] }
  0x51   :  { %2621 = vmatpush3.bf16.msra.mxu1 %v2763_v39  ;;  %2600 = vmatprep.subr.bf16.mxu0 %v2764_v40  ;;  %v71_v39 = vpack.c.bf16 %v55_v37, %v39_v36  ;;  %v57_v40 = vld [vmem:[%s3686_s0 + $0xf8] sm:$0xff] }
  0x52   :  { %2622 = vmatprep.subr.bf16.mxu1 %v2765_v41  ;;  %v38_v41 = vld [vmem:[%s3686_s0 + $0x60] sm:$0xff] }
  0x54   :  { %2601 = vmatpush3.bf16.msra.mxu0 %v2766_v42  ;;  %v54_v42 = vld [vmem:[%s3686_s0 + $0xe0] sm:$0xff] }
  0x55   :  { %2623 = vmatpush3.bf16.msra.mxu1 %v2767_v43  ;;  %2602 = vmatprep.subr.bf16.mxu0 %v2768_v44  ;;  %v73_v43 = vpack.c.bf16 %v57_v40, %v41_v38  ;;  %v70_v44 = vpack.c.bf16 %v54_v42, %v38_v41 }
  0x56   :  { %2624 = vmatprep.subr.bf16.mxu1 %v2769_v45  ;;  %v40_v45 = vld [vmem:[%s3686_s0 + $0x70] sm:$0xff] }
  0x58   :  { %2603 = vmatpush3.bf16.msra.mxu0 %v2770_v46  ;;  %v56_v46 = vld [vmem:[%s3686_s0 + $0xf0] sm:$0xff] }
  0x59   :  { %2625 = vmatpush3.bf16.msra.mxu1 %v2771_v47  ;;  %2604 = vmatprep.subr.bf16.mxu0 %v2772_v48  ;;  %v72_v47 = vpack.c.bf16 %v56_v46, %v40_v45 }
  0x5a   :  { %2626 = vmatprep.subr.bf16.mxu1 %v2773_v49 }
  0x5c   :  { %2605 = vmatpush3.bf16.msra.mxu0 %v2774_v50 }
  0x5d   :  { %2627 = vmatpush3.bf16.msra.mxu1 %v2775_v51  ;;  %2606 = vmatprep.subr.bf16.mxu0 %v2776_v52 }
  0x5e   :  { %2628 = vmatprep.subr.bf16.mxu1 %v2777_v53 }
  0x60   :  { %2607 = vmatpush3.bf16.msra.mxu0 %v2778_v54 }
  0x61   :  { %2629 = vmatpush3.bf16.msra.mxu1 %v2779_v55  ;;  %2636 = vmatprep.subr.bf16.mxu0 %v2780_v4 }
  0x62   :  { %2658 = vmatprep.subr.bf16.mxu1 %v2781_v5 }
  0x63   :  { %1302 = vmatmul.mubr.bf16.vlgmr.msra.gmra.mxu0 %v66_v2 }
  0x64   :  { %1343 = vmatmul.mubr.bf16.vlgmr.msra.gmra.mxu1 %v68_v3  ;;  %2637 = vmatpush3.bf16.msra.mxu0 %v2782_v6 }
  0x65   :  { %2659 = vmatpush3.bf16.msra.mxu1 %v2783_v7  ;;  %2638 = vmatprep.subr.bf16.mxu0 %v2784_v8 }
  0x66   :  { %2660 = vmatprep.subr.bf16.mxu1 %v2785_v9  ;;  %1383 = vmatprep.mubr.bf16.mxu0 %v71_v39 }
  0x68   :  { %2639 = vmatpush3.bf16.msra.mxu0 %v2786_v10 }
  0x69   :  { %2661 = vmatpush3.bf16.msra.mxu1 %v2787_v11  ;;  %2640 = vmatprep.subr.bf16.mxu0 %v2788_v12 }
  0x6a   :  { %2662 = vmatprep.subr.bf16.mxu1 %v2789_v13 }
  0x6c   :  { %2641 = vmatpush3.bf16.msra.mxu0 %v2790_v14 }
  0x6d   :  { %2663 = vmatpush3.bf16.msra.mxu1 %v2791_v15  ;;  %2642 = vmatprep.subr.bf16.mxu0 %v2792_v16 }
  0x6e   :  { %2664 = vmatprep.subr.bf16.mxu1 %v2793_v17 }
  0x70   :  { %2643 = vmatpush3.bf16.msra.mxu0 %v2794_v18 }
  0x71   :  { %2665 = vmatpush3.bf16.msra.mxu1 %v2795_v19  ;;  %2644 = vmatprep.subr.bf16.mxu0 %v2796_v20 }
  0x72   :  { %2666 = vmatprep.subr.bf16.mxu1 %v2797_v21 }
  0x74   :  { %2645 = vmatpush3.bf16.msra.mxu0 %v2798_v22 }
  0x75   :  { %2667 = vmatpush3.bf16.msra.mxu1 %v2799_v23  ;;  %2646 = vmatprep.subr.bf16.mxu0 %v2800_v24 }
  0x76   :  { %2668 = vmatprep.subr.bf16.mxu1 %v2801_v25 }
  0x78   :  { %2647 = vmatpush3.bf16.msra.mxu0 %v2802_v26 }
  0x79   :  { %2669 = vmatpush3.bf16.msra.mxu1 %v2803_v27  ;;  %2648 = vmatprep.subr.bf16.mxu0 %v2804_v28 }
  0x7a   :  { %2670 = vmatprep.subr.bf16.mxu1 %v2805_v29 }
  0x7c   :  { %2649 = vmatpush3.bf16.msra.mxu0 %v2806_v30 }
  0x7d   :  { %2671 = vmatpush3.bf16.msra.mxu1 %v2807_v31  ;;  %2650 = vmatprep.subr.bf16.mxu0 %v2808_v32 }
  0x7e   :  { %2672 = vmatprep.subr.bf16.mxu1 %v2809_v33 }
  0x80   :  { %2651 = vmatpush3.bf16.msra.mxu0 %v2810_v34 }
  0x81   :  { %2673 = vmatpush3.bf16.msra.mxu1 %v2811_v35 }
  0x82   :  { %10 = vsyncpa [#allocation4], 0  ;;  %1424 = vmatprep.mubr.bf16.mxu1 %v73_v43  ;;  %v1455_v48 = vld [vmem:[%s3689_s3 + $0x80] sm:$0xff]  ;;  %v1456_v50 = vld [vmem:[%s3689_s3 + $0x88] sm:$0xff]  ;;  %v2962_v56 = vmov 0   ;;  %vm1433_vm0 = vcmask 261120  }
  0x83   :  { %1384 = vmatmul.mubr.bf16.vlgmr.msra.gmra.mxu0 %v70_v44  ;;  %v1463_v49 = vld [vmem:[%s3689_s3 + $0xc0] sm:$0xff]  ;;  %v1464_v53 = vld [vmem:[%s3689_s3 + $0xc8] sm:$0xff]  ;;  %v3505_v62 = vld [vmem:[%s3689_s3 + $0x90] sm:$0xff] }
  0x84   :  { %1425 = vmatmul.mubr.bf16.vlgmr.msra.gmra.mxu1 %v72_v47  ;;  %v2448_v51 = vcombine.low %v1455_v48, %v1463_v49  ;;  %v2449_v52 = vcombine.high %v1455_v48, %v1463_v49  ;;  %v1439_v54 = vld [vmem:[%s3689_s3] sm:$0xff]  ;;  %1751 = vmatprep.mubr.bf16.mxu0 %v2962_v56  ;;  %v2450_v57 = vcombine.low %v1456_v50, %v1464_v53  ;;  %v1440_v60 = vld [vmem:[%s3689_s3 + $0x8] sm:$0xff]  ;;  %v3510_v0 = vld [vmem:[%s3689_s3 + $0xd0] sm:$0xff] }
  0x85   :  { %v1447_v55 = vld [vmem:[%s3689_s3 + $0x40] sm:$0xff]  ;;  %1794 = vmatprep.mubr.bf16.mxu1 %v2962_v56  ;;  %v2451_v58 = vcombine.high %v1456_v50, %v1464_v53  ;;  %v1448_v61 = vld [vmem:[%s3689_s3 + $0x48] sm:$0xff]  ;;  %v3515_v1 = vld [vmem:[%s3689_s3 + $0x98] sm:$0xff]  ;;  %v2452_v4 = vcombine.low %v3505_v62, %v3510_v0  ;;  %v2453_v7 = vcombine.high %v3505_v62, %v3510_v0 }
  0x86   :  { %v2433_v59 = vcombine.high %v1439_v54, %v1447_v55  ;;  %1731 = vmatprep.subr.bf16.mxu0 %v2449_v52  ;;  %v2435_v63 = vcombine.high %v1440_v60, %v1448_v61  ;;  %v3520_v2 = vld [vmem:[%s3689_s3 + $0xd8] sm:$0xff]  ;;  %v2432_v3 = vcombine.low %v1439_v54, %v1447_v55  ;;  %v2434_v6 = vcombine.low %v1440_v60, %v1448_v61  ;;  %v2303_v25 = vld [vmem:[%s3688_s2] ss:$0 sm:$0xff]  ;;  %v1444_v0 = vld [vmem:[%s3689_s3 + $0x28] sm:$0xff] }
  0x87   :  { %1774 = vmatprep.subr.bf16.mxu1 %v2451_v58  ;;  %1732 = vmatpush1.bf16.msra.mxu0 %v2448_v51  ;;  %v2454_v5 = vcombine.low %v3515_v1, %v3520_v2  ;;  %v2455_v8 = vcombine.high %v3515_v1, %v3520_v2  ;;  %v1451_v62 = vld [vmem:[%s3689_s3 + $0x60] sm:$0xff]  ;;  %v1452_v1 = vld [vmem:[%s3689_s3 + $0x68] sm:$0xff] }
  0x88   :  { %1775 = vmatpush1.bf16.msra.mxu1 %v2450_v57  ;;  %1733 = vmatprep.subr.bf16.mxu0 %v2433_v59 }
  0x89   :  { %1776 = vmatprep.subr.bf16.mxu1 %v2435_v63 }
  0x8b   :  { %1734 = vmatpush1.bf16.msra.mxu0 %v2432_v3 }
  0x8c   :  { %1777 = vmatpush1.bf16.msra.mxu1 %v2434_v6  ;;  %1817 = vmatprep.subr.bf16.mxu0 %v2453_v7 }
  0x8d   :  { %1860 = vmatprep.subr.bf16.mxu1 %v2455_v8 }
  0xe3   :  { %v2520_v9 = vpop.f32.mrf.mxu0 }
  0xe4   :  { %v2542_v10 = vpop.f32.mrf.mxu1 }
  0xe5   :  { %v2521_v11 = vpop.f32.mrf.mxu0 }
  0xe6   :  { %v2543_v12 = vpop.f32.mrf.mxu1  ;;  %v2522_v24 = vadd.f32 %v2521_v11, %v2520_v9 }
  0xe7   :  { %v2523_v13 = vpop.f32.mrf.mxu0  ;;  %v2544_v29 = vadd.f32 %v2543_v12, %v2542_v10 }
  0xe8   :  { %v2545_v14 = vpop.f32.mrf.mxu1  ;;  %v1140_v28 = vadd.f32 %v2522_v24, %v2303_v25 }
  0xe9   :  { %v2524_v15 = vpop.f32.mrf.mxu0 }
  0xea   :  { %v2546_v17 = vpop.f32.mrf.mxu1  ;;  %v2525_v30 = vadd.f32 %v2524_v15, %v2523_v13  ;;  %v1181_v34 = vadd.f32 %v2544_v29, %v1140_v28  ;;  %v1460_v28 = vld [vmem:[%s3689_s3 + $0xa8] sm:$0xff] }
  0xeb   :  { %v2547_v38 = vadd.f32 %v2546_v17, %v2545_v14  ;;  %v1441_v17 = vld [vmem:[%s3689_s3 + $0x10] sm:$0xff]  ;;  %v1468_v29 = vld [vmem:[%s3689_s3 + $0xe8] sm:$0xff] }
  0xec   :  { %v1143_v35 = vadd.f32 %v2525_v30, %v2303_v25 }
  0xee   :  { %v1184_v42 = vadd.f32 %v2547_v38, %v1143_v35  ;;  %v2443_v35 = vcombine.high %v1444_v0, %v1452_v1  ;;  %v1462_v38 = vld [vmem:[%s3689_s3 + $0xb8] sm:$0xff] }
 0x103   :  { %v2564_v16 = vpop.f32.mrf.mxu0 }
 0x104   :  { %v2586_v18 = vpop.f32.mrf.mxu1 }
 0x105   :  { %v2565_v19 = vpop.f32.mrf.mxu0 }
 0x106   :  { %v2587_v20 = vpop.f32.mrf.mxu1  ;;  %v2566_v33 = vadd.f32 %v2565_v19, %v2564_v16  ;;  %v1442_v19 = vld [vmem:[%s3689_s3 + $0x18] sm:$0xff] }
 0x107   :  { %v2567_v21 = vpop.f32.mrf.mxu0  ;;  %v2588_v40 = vadd.f32 %v2587_v20, %v2586_v18  ;;  %v1449_v18 = vld [vmem:[%s3689_s3 + $0x50] sm:$0xff]  ;;  %v1450_v20 = vld [vmem:[%s3689_s3 + $0x58] sm:$0xff] }
 0x108   :  { %v2589_v22 = vpop.f32.mrf.mxu1  ;;  %v1222_v39 = vadd.f32 %v2566_v33, %v1181_v34  ;;  %v2437_v24 = vcombine.high %v1441_v17, %v1449_v18  ;;  %v2439_v25 = vcombine.high %v1442_v19, %v1450_v20  ;;  %v2436_v30 = vcombine.low %v1441_v17, %v1449_v18  ;;  %v1443_v34 = vld [vmem:[%s3689_s3 + $0x20] sm:$0xff] }
 0x109   :  { %v2568_v23 = vpop.f32.mrf.mxu0  ;;  %v2459_v33 = vcombine.high %v1460_v28, %v1468_v29 }
 0x10a   :  { %v2590_v27 = vpop.f32.mrf.mxu1  ;;  %v2569_v41 = vadd.f32 %v2568_v23, %v2567_v21  ;;  %v1263_v46 = vadd.f32 %v2588_v40, %v1222_v39  ;;  %v1470_v39 = vld [vmem:[%s3689_s3 + $0xf8] sm:$0xff]  ;;  %v2440_v40 = vcombine.low %v1443_v34, %v1451_v62 }
 0x10b   :  { %v2591_v48 = vadd.f32 %v2590_v27, %v2589_v22  ;;  %v1467_v27 = vld [vmem:[%s3689_s3 + $0xe0] sm:$0xff] }
 0x10c   :  { %v1225_v47 = vadd.f32 %v2569_v41, %v1184_v42  ;;  %v2442_v41 = vcombine.low %v1444_v0, %v1452_v1 }
 0x10e   :  { %v1266_v54 = vadd.f32 %v2591_v48, %v1225_v47  ;;  %v1454_v47 = vld [vmem:[%s3689_s3 + $0x78] sm:$0xff] }
 0x123   :  { %v2608_v26 = vpop.f32.mrf.mxu0 }
 0x124   :  { %v2630_v31 = vpop.f32.mrf.mxu1 }
 0x125   :  { %v2609_v32 = vpop.f32.mrf.mxu0 }
 0x126   :  { %v2631_v36 = vpop.f32.mrf.mxu1  ;;  %v2610_v43 = vadd.f32 %v2609_v32, %v2608_v26  ;;  %v1459_v26 = vld [vmem:[%s3689_s3 + $0xa0] sm:$0xff] }
 0x127   :  { %v2611_v37 = vpop.f32.mrf.mxu0  ;;  %v2632_v50 = vadd.f32 %v2631_v36, %v2630_v31  ;;  %v2438_v31 = vcombine.low %v1442_v19, %v1450_v20  ;;  %v2457_v32 = vcombine.high %v1459_v26, %v1467_v27  ;;  %v2456_v2 = vcombine.low %v1459_v26, %v1467_v27  ;;  %v1461_v36 = vld [vmem:[%s3689_s3 + $0xb0] sm:$0xff] }
 0x128   :  { %v2633_v44 = vpop.f32.mrf.mxu1  ;;  %v1304_v49 = vadd.f32 %v2610_v43, %v1263_v46  ;;  %v2463_v43 = vcombine.high %v1462_v38, %v1470_v39  ;;  %v1446_v46 = vld [vmem:[%s3689_s3 + $0x38] sm:$0xff] }
 0x129   :  { %v2612_v45 = vpop.f32.mrf.mxu0 }
 0x12a   :  { %v2613_v51 = vadd.f32 %v2612_v45, %v2611_v37  ;;  %v2634_v52 = vpop.f32.mrf.mxu1  ;;  %v1345_v58 = vadd.f32 %v2632_v50, %v1304_v49  ;;  %v1469_v37 = vld [vmem:[%s3689_s3 + $0xf0] sm:$0xff]  ;;  %v2462_v49 = vcombine.low %v1462_v38, %v1470_v39 }
 0x12b   :  { %v2635_v3 = vadd.f32 %v2634_v52, %v2633_v44  ;;  %v2461_v42 = vcombine.high %v1461_v36, %v1469_v37  ;;  %v1445_v44 = vld [vmem:[%s3689_s3 + $0x30] sm:$0xff]  ;;  %v2460_v48 = vcombine.low %v1461_v36, %v1469_v37 }
 0x12c   :  { %v1307_v59 = vadd.f32 %v2613_v51, %v1266_v54  ;;  %v1453_v45 = vld [vmem:[%s3689_s3 + $0x70] sm:$0xff]  ;;  %v2447_v51 = vcombine.high %v1446_v46, %v1454_v47  ;;  %v1475_v54 = vlaneseq }
 0x12d   :  { %v2445_v50 = vcombine.high %v1445_v44, %v1453_v45  ;;  %v2444_v52 = vcombine.low %v1445_v44, %v1453_v45 }
 0x12e   :  { %v1348_v10 = vadd.f32 %v2635_v3, %v1307_v59  ;;  %v1471_v59 = vld [vmem:[%s3690_s4] sm:$0xff] }
 0x143   :  { %v2652_v53 = vpop.f32.mrf.mxu0 }
 0x144   :  { %v2674_v55 = vpop.f32.mrf.mxu1 }
 0x145   :  { %v2653_v57 = vpop.f32.mrf.mxu0 }
 0x146   :  { %v2654_v60 = vadd.f32 %v2653_v57, %v2652_v53  ;;  %v2675_v61 = vpop.f32.mrf.mxu1  ;;  %v2446_v53 = vcombine.low %v1446_v46, %v1454_v47 }
 0x147   :  { %v2655_v63 = vpop.f32.mrf.mxu0  ;;  %v2676_v7 = vadd.f32 %v2675_v61, %v2674_v55  ;;  %v3625_v55 = vshrl.u32 %v1475_v54, 7 }
 0x148   :  { %v1386_v6 = vadd.f32 %v2654_v60, %v1345_v58  ;;  %v2677_v8 = vpop.f32.mrf.mxu1 }
 0x149   :  { %v2656_v9 = vpop.f32.mrf.mxu0  ;;  %v1477_v57 = vsub.s32 0, %v3625_v55  ;;  %v1485_v58 = vsub.s32 2, %v3625_v55  ;;  %v1489_v60 = vsub.s32 3, %v3625_v55 }
 0x14a   :  { %v1427_v11 = vadd.f32 %v2676_v7, %v1386_v6  ;;  %v2657_v12 = vadd.f32 %v2656_v9, %v2655_v63  ;;  %v2678_v13 = vpop.f32.mrf.mxu1  ;;  %v1493_v9 = vsub.s32 4, %v3625_v55 }
 0x14b   :  { %v2679_v15 = vadd.f32 %v2678_v13, %v2677_v8  ;;  %v1478_v61 = vrot.slane %v1471_v59, %v1477_v57  ;;  %v1486_v63 = vrot.slane %v1471_v59, %v1485_v58  ;;  %v1490_v6 = vrot.slane %v1471_v59, %v1489_v60 }
 0x14c   :  { %1434 = vst.msk [vmem:[#allocation2] sm:$0xff] %vm1433_vm0, %v1427_v11  ;;  %v1389_v14 = vadd.f32 %v2657_v12, %v1348_v10  ;;  %v1501_v10 = vsub.s32 6, %v3625_v55 }
 0x14e   :  { %v1430_v16 = vadd.f32 %v2679_v15, %v1389_v14  ;;  %v1497_v15 = vsub.s32 5, %v3625_v55 }
 0x150   :  { %1435 = vst.msk [vmem:[#allocation2 + $0x8] sm:$0xff] %vm1433_vm0, %v1430_v16  ;;  %v1505_v16 = vsub.s32 7, %v3625_v55 }
 0x153   :  { %v1436_v21 = vld [vmem:[#allocation2] sm:$0xff] }
 0x157   :  { %v1437_v22 = vld [vmem:[#allocation2 + $0x8] sm:$0xff] }
 0x158   :  { %v3547_v23 = vpack.c.bf16 %v1437_v22, %v1436_v21 }
 0x15a   :  { %2464 = vmatmul.mubr.msk.bf16.vlgmr.msra.gmra.mxu0 %vm1433_vm0, %v3547_v23  ;;  %2465 = vmatmul.mubr.msk.bf16.vlgmr.msra.gmra.mxu1 %vm1433_vm0, %v3547_v23 }
 0x15b   :  { %1818 = vmatpush1.bf16.msra.mxu0 %v2452_v4  ;;  %1861 = vmatpush1.bf16.msra.mxu1 %v2454_v5  ;;  %v2458_v4 = vcombine.low %v1460_v28, %v1468_v29  ;;  %v2441_v5 = vcombine.high %v1443_v34, %v1451_v62 }
 0x15c   :  { %1819 = vmatprep.subr.bf16.mxu0 %v2437_v24  ;;  %1862 = vmatprep.subr.bf16.mxu1 %v2439_v25  ;;  %v1502_v24 = vrot.slane %v1471_v59, %v1501_v10 }
 0x15d   :  { %1837 = vmatprep.mubr.bf16.mxu0 %v2962_v56  ;;  %1880 = vmatprep.mubr.bf16.mxu1 %v2962_v56 }
 0x15f   :  { %1820 = vmatpush1.bf16.msra.mxu0 %v2436_v30  ;;  %1863 = vmatpush1.bf16.msra.mxu1 %v2438_v31  ;;  %v1498_v31 = vrot.slane %v1471_v59, %v1497_v15 }
 0x160   :  { %1903 = vmatprep.subr.bf16.mxu0 %v2457_v32  ;;  %1946 = vmatprep.subr.bf16.mxu1 %v2459_v33  ;;  %v1506_v32 = vrot.slane %v1471_v59, %v1505_v16 }
 0x162   :  { %2466 = vmatmul.mubr.msk.bf16.vlgmr.msra.gmra.mxu0 %vm1433_vm0, %v3547_v23  ;;  %2467 = vmatmul.mubr.msk.bf16.vlgmr.msra.gmra.mxu1 %vm1433_vm0, %v3547_v23 }
 0x163   :  { %1904 = vmatpush1.bf16.msra.mxu0 %v2456_v2  ;;  %1947 = vmatpush1.bf16.msra.mxu1 %v2458_v4 }
 0x164   :  { %1905 = vmatprep.subr.bf16.mxu0 %v2441_v5  ;;  %1948 = vmatprep.subr.bf16.mxu1 %v2443_v35 }
 0x165   :  { %1923 = vmatprep.mubr.bf16.mxu0 %v2962_v56  ;;  %1966 = vmatprep.mubr.bf16.mxu1 %v2962_v56 }
 0x167   :  { %1906 = vmatpush1.bf16.msra.mxu0 %v2440_v40  ;;  %1949 = vmatpush1.bf16.msra.mxu1 %v2442_v41 }
 0x168   :  { %1989 = vmatprep.subr.bf16.mxu0 %v2461_v42  ;;  %2032 = vmatprep.subr.bf16.mxu1 %v2463_v43 }
 0x16a   :  { %2468 = vmatmul.mubr.msk.bf16.vlgmr.msra.gmra.mxu0 %vm1433_vm0, %v3547_v23  ;;  %2469 = vmatmul.mubr.msk.bf16.vlgmr.msra.gmra.mxu1 %vm1433_vm0, %v3547_v23 }
 0x16b   :  { %1990 = vmatpush1.bf16.msra.mxu0 %v2460_v48  ;;  %2033 = vmatpush1.bf16.msra.mxu1 %v2462_v49 }
 0x16c   :  { %1991 = vmatprep.subr.bf16.mxu0 %v2445_v50  ;;  %2034 = vmatprep.subr.bf16.mxu1 %v2447_v51 }
 0x16d   :  { %2009 = vmatprep.mubr.bf16.mxu0 %v2962_v56  ;;  %2052 = vmatprep.mubr.bf16.mxu1 %v2962_v56  ;;  %v1481_v56 = vsub.s32 1, %v3625_v55 }
 0x16f   :  { %1992 = vmatpush1.bf16.msra.mxu0 %v2444_v52  ;;  %2035 = vmatpush1.bf16.msra.mxu1 %v2446_v53  ;;  %v1482_v3 = vrot.slane %v1471_v59, %v1481_v56 }
 0x172   :  { %2470 = vmatmul.mubr.msk.bf16.vlgmr.msra.gmra.mxu0 %vm1433_vm0, %v3547_v23  ;;  %2471 = vmatmul.mubr.msk.bf16.vlgmr.msra.gmra.mxu1 %vm1433_vm0, %v3547_v23  ;;  %v1494_v23 = vrot.slane %v1471_v59, %v1493_v9 }
 0x21a   :  { %v1753_v7 = vpop.f32.mrf.mxu0  ;;  %v1796_v8 = vpop.f32.mrf.mxu1 }
 0x21b   :  { %v1754_v11 = vadd.f32 %v1753_v7, %v1478_v61  ;;  %v1797_v12 = vadd.f32 %v1796_v8, %v1486_v63 }
 0x21c   :  { %v1755_v13 = vpop.f32.mrf.mxu0  ;;  %v1798_v14 = vpop.f32.mrf.mxu1 }
 0x21d   :  { %v2472_v17 = vmul.f32 -1.442695, %v1754_v11  ;;  %v2474_v18 = vmul.f32 -1.442695, %v1797_v12  ;;  %v1756_v19 = vadd.f32 %v1755_v13, %v1482_v3  ;;  %v1799_v20 = vadd.f32 %v1798_v14, %v1490_v6 }
 0x21e   :  { %v1757_v21 = vpop.f32.mrf.mxu0  ;;  %v1800_v22 = vpop.f32.mrf.mxu1 }
 0x21f   :  { %2812 = vpow2.f32 %v2472_v17  ;;  %v2473_v25 = vmul.f32 -1.442695, %v1756_v19  ;;  %v2475_v26 = vmul.f32 -1.442695, %v1799_v20  ;;  %v1758_v27 = vadd.f32 %v1757_v21, %v1478_v61 }
 0x220   :  { %2814 = vpow2.f32 %v2474_v18  ;;  %v1801_v28 = vadd.f32 %v1800_v22, %v1486_v63  ;;  %v1759_v29 = vpop.f32.mrf.mxu0  ;;  %v1802_v30 = vpop.f32.mrf.mxu1 }
 0x221   :  { %2816 = vpow2.f32 %v2473_v25  ;;  %v2488_v33 = vmul.f32 -1.442695, %v1758_v27  ;;  %v1760_v34 = vadd.f32 %v1759_v29, %v1482_v3  ;;  %v1803_v62 = vadd.f32 %v1802_v30, %v1490_v6 }
 0x222   :  { %2818 = vpow2.f32 %v2475_v26  ;;  %v2490_v0 = vmul.f32 -1.442695, %v1801_v28  ;;  %v1839_v1 = vpop.f32.mrf.mxu0  ;;  %v1882_v2 = vpop.f32.mrf.mxu1 }
 0x223   :  { %2820 = vpow2.f32 %v2488_v33  ;;  %v2489_v4 = vmul.f32 -1.442695, %v1760_v34  ;;  %v2491_v5 = vmul.f32 -1.442695, %v1803_v62  ;;  %v1840_v35 = vadd.f32 %v1839_v1, %v1494_v23 }
 0x224   :  { %2822 = vpow2.f32 %v2490_v0  ;;  %v1883_v36 = vadd.f32 %v1882_v2, %v1502_v24  ;;  %v1841_v37 = vpop.f32.mrf.mxu0  ;;  %v1884_v38 = vpop.f32.mrf.mxu1 }
 0x225   :  { %2824 = vpow2.f32 %v2489_v4  ;;  %v2476_v39 = vmul.f32 -1.442695, %v1840_v35  ;;  %v1842_v40 = vadd.f32 %v1841_v37, %v1498_v31  ;;  %v1885_v41 = vadd.f32 %v1884_v38, %v1506_v32 }
 0x226   :  { %2826 = vpow2.f32 %v2491_v5  ;;  %v2478_v42 = vmul.f32 -1.442695, %v1883_v36  ;;  %v1843_v43 = vpop.f32.mrf.mxu0  ;;  %v1886_v44 = vpop.f32.mrf.mxu1 }
 0x227   :  { %2828 = vpow2.f32 %v2476_v39  ;;  %v2477_v45 = vmul.f32 -1.442695, %v1842_v40  ;;  %v2479_v46 = vmul.f32 -1.442695, %v1885_v41  ;;  %v1844_v47 = vadd.f32 %v1843_v43, %v1494_v23  ;;  %v3657_v23 = vld [vmem:[%s3690_s4 + $0x8] sm:$0xff]  ;;  %s2963_s4 = smov [#allocation3]  }
 0x228   :  { %2830 = vpow2.f32 %v2478_v42  ;;  %v1887_v48 = vadd.f32 %v1886_v44, %v1502_v24  ;;  %v1845_v49 = vpop.f32.mrf.mxu0  ;;  %v1888_v50 = vpop.f32.mrf.mxu1  ;;  %v1518_v62 = vrot.slane %v3657_v23, %v1485_v58  ;;  %v1514_v2 = vrot.slane %v3657_v23, %v1481_v56  ;;  %s2292_s24 = sshll.u32 %s2963_s4, 4  ;;  %s2293_s24 = int_to_ptr.vmem [resolvable:$true] %s2292_s24 }
 0x229   :  { %2832 = vpow2.f32 %v2477_v45  ;;  %v2492_v51 = vmul.f32 -1.442695, %v1844_v47  ;;  %v1846_v52 = vadd.f32 %v1845_v49, %v1498_v31  ;;  %v1889_v53 = vadd.f32 %v1888_v50, %v1506_v32  ;;  %s2940_s25 = scalar_lea.vmem %s2293_s24, 4096  ;;  %p2945_p1 = scmp.lt.s32.totalorder %s2293_s24, %s2293_s24 }
 0x22a   :  { %2834 = vpow2.f32 %v2479_v46  ;;  %v2494_v54 = vmul.f32 -1.442695, %v1887_v48  ;;  %v1925_v59 = vpop.f32.mrf.mxu0  ;;  %v1968_v61 = vpop.f32.mrf.mxu1  ;;  %v1510_v31 = vrot.slane %v3657_v23, %v1477_v57  ;;  %v1522_v57 = vrot.slane %v3657_v23, %v1489_v60  ;;  %p2941_p0 = scmp.ne.s32.totalorder %s2293_s24, %s2940_s25  ;;  %p2946_p2 = scmp.lt.s32.totalorder %s2940_s25, %s2940_s25 }
 0x22b   :  { %2836 = vpow2.f32 %v2492_v51  ;;  %v2493_v63 = vmul.f32 -1.442695, %v1846_v52  ;;  %v2495_v3 = vmul.f32 -1.442695, %v1889_v53  ;;  %v1969_v41 = vadd.f32 %v1968_v61, %v1518_v62 }
 0x22c   :  { %v2813_v6 = vpop.eup %2812  ;;  %2838 = vpow2.f32 %v2494_v54  ;;  %v1927_v7 = vpop.f32.mrf.mxu0  ;;  %v1926_v38 = vadd.f32 %v1925_v59, %v1510_v31  ;;  %v1526_v44 = vrot.slane %v3657_v23, %v1493_v9  ;;  %v1534_v47 = vrot.slane %v3657_v23, %v1501_v10  ;;  %p2947_p3 = por %p2946_p2, %p2945_p1 }
 0x22d   :  { %v1970_v8 = vpop.f32.mrf.mxu1  ;;  %v2815_v11 = vpop.eup %2814  ;;  %v2159_v12 = vadd.f32 1.0, %v2813_v6  ;;  %2840 = vpow2.f32 %v2493_v63  ;;  %v1928_v43 = vadd.f32 %v1927_v7, %v1514_v2  ;;  %v2482_v61 = vmul.f32 -1.442695, %v1969_v41 }
 0x22e   :  { %v2817_v13 = vpop.eup %2816  ;;  %v2161_v14 = vadd.f32 1.0, %v2815_v11  ;;  %2842 = vpow2.f32 %v2495_v3  ;;  %v1929_v17 = vpop.f32.mrf.mxu0  ;;  %v1971_v46 = vadd.f32 %v1970_v8, %v1522_v57  ;;  %v2480_v51 = vmul.f32 -1.442695, %v1926_v38  ;;  %p2948_p4 = pnand %p2947_p3, %p2941_p0 }
 0x22f   :  { %v2819_v18 = vpop.eup %2818  ;;  %2844 = vrcp.f32 %v2159_v12  ;;  %v2160_v19 = vadd.f32 1.0, %v2817_v13  ;;  %v1972_v20 = vpop.f32.mrf.mxu1  ;;  %v1930_v52 = vadd.f32 %v1929_v17, %v1510_v31  ;;  %v2481_v3 = vmul.f32 -1.442695, %v1928_v43 }
 0x230   :  { %v2821_v21 = vpop.eup %2820  ;;  %2846 = vrcp.f32 %v2161_v14  ;;  %v2162_v22 = vadd.f32 1.0, %v2819_v18  ;;  %v1931_v28 = vpop.f32.mrf.mxu0  ;;  %v1973_v9 = vadd.f32 %v1972_v20, %v1518_v62  ;;  %v1530_v10 = vrot.slane %v3657_v23, %v1497_v15 }
 0x231   :  { %v2823_v24 = vpop.eup %2822  ;;  %2848 = vrcp.f32 %v2160_v19  ;;  %v2175_v25 = vadd.f32 1.0, %v2821_v21  ;;  %v1974_v32 = vpop.f32.mrf.mxu1  ;;  %v1932_v6 = vadd.f32 %v1931_v28, %v1514_v2  ;;  %v2483_v8 = vmul.f32 -1.442695, %v1971_v46 }
 0x232   :  { %v2825_v26 = vpop.eup %2824  ;;  %2850 = vrcp.f32 %v2162_v22  ;;  %v2177_v27 = vadd.f32 1.0, %v2823_v24  ;;  %v2011_v35 = vpop.f32.mrf.mxu0  ;;  %v1975_v11 = vadd.f32 %v1974_v32, %v1522_v57  ;;  %v1538_v12 = vrot.slane %v3657_v23, %v1505_v16 }
 0x233   :  { %v2827_v29 = vpop.eup %2826  ;;  %2852 = vrcp.f32 %v2175_v25  ;;  %v2176_v30 = vadd.f32 1.0, %v2825_v26  ;;  %v2054_v58 = vpop.f32.mrf.mxu1  ;;  %v2496_v17 = vmul.f32 -1.442695, %v1930_v52  ;;  %v2012_v18 = vadd.f32 %v2011_v35, %v1526_v44 }
 0x234   :  { %v2829_v33 = vpop.eup %2828  ;;  %2854 = vrcp.f32 %v2177_v27  ;;  %v2178_v34 = vadd.f32 1.0, %v2827_v29  ;;  %v2013_v48 = vpop.f32.mrf.mxu0  ;;  %v2498_v15 = vmul.f32 -1.442695, %v1973_v9  ;;  %v2055_v21 = vadd.f32 %v2054_v58, %v1534_v47 }
 0x235   :  { %v2831_v0 = vpop.eup %2830  ;;  %2856 = vrcp.f32 %v2176_v30  ;;  %v2163_v1 = vadd.f32 1.0, %v2829_v33  ;;  %v2056_v53 = vpop.f32.mrf.mxu1  ;;  %v2497_v24 = vmul.f32 -1.442695, %v1932_v6  ;;  %v2014_v25 = vadd.f32 %v2013_v48, %v1530_v10 }
 0x236   :  { %v2833_v4 = vpop.eup %2832  ;;  %2858 = vrcp.f32 %v2178_v34  ;;  %v2165_v5 = vadd.f32 1.0, %v2831_v0  ;;  %v2015_v13 = vpop.f32.mrf.mxu0  ;;  %v2499_v16 = vmul.f32 -1.442695, %v1975_v11  ;;  %v2057_v23 = vadd.f32 %v2056_v53, %v1538_v12 }
 0x237   :  { %v2835_v36 = vpop.eup %2834  ;;  %2860 = vrcp.f32 %v2163_v1  ;;  %v2164_v37 = vadd.f32 1.0, %v2833_v4  ;;  %v2058_v19 = vpop.f32.mrf.mxu1  ;;  %v2484_v28 = vmul.f32 -1.442695, %v2012_v18  ;;  %v2016_v29 = vadd.f32 %v2015_v13, %v1526_v44 }
 0x238   :  { %v2837_v39 = vpop.eup %2836  ;;  %2862 = vrcp.f32 %v2165_v5  ;;  %v2166_v40 = vadd.f32 1.0, %v2835_v36  ;;  %v2017_v26 = vpop.f32.mrf.mxu0  ;;  %v2486_v32 = vmul.f32 -1.442695, %v2055_v21  ;;  %v2059_v33 = vadd.f32 %v2058_v19, %v1534_v47 }
 0x239   :  { %v2839_v42 = vpop.eup %2838  ;;  %2864 = vrcp.f32 %v2164_v37  ;;  %v2179_v56 = vadd.f32 1.0, %v2837_v39  ;;  %v2060_v30 = vpop.f32.mrf.mxu1  ;;  %v2485_v62 = vmul.f32 -1.442695, %v2014_v25  ;;  %v2018_v0 = vadd.f32 %v2017_v26, %v1530_v10 }
 0x23a   :  { %v2841_v45 = vpop.eup %2840  ;;  %2866 = vrcp.f32 %v2166_v40  ;;  %v2181_v60 = vadd.f32 1.0, %v2839_v42  ;;  %v2487_v2 = vmul.f32 -1.442695, %v2057_v23  ;;  %v2061_v4 = vadd.f32 %v2060_v30, %v1538_v12 }
 0x23b   :  { %v2843_v49 = vpop.eup %2842  ;;  %2868 = vrcp.f32 %v2179_v56  ;;  %v2180_v50 = vadd.f32 1.0, %v2841_v45  ;;  %v2500_v57 = vmul.f32 -1.442695, %v2016_v29  ;;  %v2502_v36 = vmul.f32 -1.442695, %v2059_v33 }
 0x23c   :  { %v2845_v54 = vpop.eup %2844  ;;  %2870 = vrcp.f32 %v2181_v60  ;;  %v2182_v59 = vadd.f32 1.0, %v2843_v49  ;;  %v2501_v38 = vmul.f32 -1.442695, %v2018_v0  ;;  %v2503_v39 = vmul.f32 -1.442695, %v2061_v4 }
 0x23d   :  { %v2847_v63 = vpop.eup %2846  ;;  %2255 = vst [vmem:[#allocation3] sm:$0xff] %v2845_v54  ;;  %2872 = vrcp.f32 %v2180_v50 }
 0x23e   :  { %v2849_v7 = vpop.eup %2848  ;;  %2257 = vst [vmem:[#allocation3 + $0x10] sm:$0xff] %v2847_v63  ;;  %2874 = vrcp.f32 %v2182_v59 }
 0x23f   :  { %v2851_v14 = vpop.eup %2850  ;;  %2256 = vst [vmem:[#allocation3 + $0x8] sm:$0xff] %v2849_v7  ;;  %2876 = vpow2.f32 %v2480_v51 }
 0x240   :  { %v2853_v20 = vpop.eup %2852  ;;  %2258 = vst [vmem:[#allocation3 + $0x18] sm:$0xff] %v2851_v14  ;;  %2878 = vpow2.f32 %v2482_v61 }
 0x241   :  { %v2855_v22 = vpop.eup %2854  ;;  %2271 = vst [vmem:[#allocation3 + $0x80] sm:$0xff] %v2853_v20  ;;  %2880 = vpow2.f32 %v2481_v3 }
 0x242   :  { %v2857_v55 = vpop.eup %2856  ;;  %2273 = vst [vmem:[#allocation3 + $0x90] sm:$0xff] %v2855_v22  ;;  %2882 = vpow2.f32 %v2483_v8 }
 0x243   :  { %v2859_v27 = vpop.eup %2858  ;;  %2272 = vst [vmem:[#allocation3 + $0x88] sm:$0xff] %v2857_v55  ;;  %2884 = vpow2.f32 %v2496_v17 }
 0x244   :  { %v2861_v31 = vpop.eup %2860  ;;  %2274 = vst [vmem:[#allocation3 + $0x98] sm:$0xff] %v2859_v27  ;;  %2886 = vpow2.f32 %v2498_v15 }
 0x245   :  { %v2863_v34 = vpop.eup %2862  ;;  %2259 = vst [vmem:[#allocation3 + $0x20] sm:$0xff] %v2861_v31  ;;  %2888 = vpow2.f32 %v2497_v24 }
 0x246   :  { %v2865_v1 = vpop.eup %2864  ;;  %2261 = vst [vmem:[#allocation3 + $0x30] sm:$0xff] %v2863_v34  ;;  %2890 = vpow2.f32 %v2499_v16 }
 0x247   :  { %v2867_v5 = vpop.eup %2866  ;;  %2260 = vst [vmem:[#allocation3 + $0x28] sm:$0xff] %v2865_v1  ;;  %2892 = vpow2.f32 %v2484_v28 }
 0x248   :  { %v2869_v35 = vpop.eup %2868  ;;  %2262 = vst [vmem:[#allocation3 + $0x38] sm:$0xff] %v2867_v5  ;;  %2894 = vpow2.f32 %v2486_v32 }
 0x249   :  { %v2871_v37 = vpop.eup %2870  ;;  %2275 = vst [vmem:[#allocation3 + $0xa0] sm:$0xff] %v2869_v35  ;;  %2896 = vpow2.f32 %v2485_v62 }
 0x24a   :  { %v2873_v58 = vpop.eup %2872  ;;  %2277 = vst [vmem:[#allocation3 + $0xb0] sm:$0xff] %v2871_v37  ;;  %2898 = vpow2.f32 %v2487_v2 }
 0x24b   :  { %v2875_v40 = vpop.eup %2874  ;;  %2276 = vst [vmem:[#allocation3 + $0xa8] sm:$0xff] %v2873_v58  ;;  %2900 = vpow2.f32 %v2500_v57 }
 0x24c   :  { %v2877_v41 = vpop.eup %2876  ;;  %2278 = vst [vmem:[#allocation3 + $0xb8] sm:$0xff] %v2875_v40  ;;  %2902 = vpow2.f32 %v2502_v36 }
 0x24d   :  { %v2879_v42 = vpop.eup %2878  ;;  %v2167_v56 = vadd.f32 1.0, %v2877_v41  ;;  %2904 = vpow2.f32 %v2501_v38 }
 0x24e   :  { %v2881_v43 = vpop.eup %2880  ;;  %v2169_v44 = vadd.f32 1.0, %v2879_v42  ;;  %2906 = vpow2.f32 %v2503_v39 }
 0x24f   :  { %v2883_v45 = vpop.eup %2882  ;;  %2908 = vrcp.f32 %v2167_v56  ;;  %v2168_v60 = vadd.f32 1.0, %v2881_v43 }
 0x250   :  { %v2885_v46 = vpop.eup %2884  ;;  %2910 = vrcp.f32 %v2169_v44  ;;  %v2170_v47 = vadd.f32 1.0, %v2883_v45 }
 0x251   :  { %v2887_v48 = vpop.eup %2886  ;;  %2912 = vrcp.f32 %v2168_v60  ;;  %v2183_v49 = vadd.f32 1.0, %v2885_v46 }
 0x252   :  { %v2889_v50 = vpop.eup %2888  ;;  %2914 = vrcp.f32 %v2170_v47  ;;  %v2185_v51 = vadd.f32 1.0, %v2887_v48 }
 0x253   :  { %v2891_v52 = vpop.eup %2890  ;;  %2916 = vrcp.f32 %v2183_v49  ;;  %v2184_v53 = vadd.f32 1.0, %v2889_v50 }
 0x254   :  { %v2893_v54 = vpop.eup %2892  ;;  %2918 = vrcp.f32 %v2185_v51  ;;  %v2186_v59 = vadd.f32 1.0, %v2891_v52 }
 0x255   :  { %v2895_v61 = vpop.eup %2894  ;;  %2920 = vrcp.f32 %v2184_v53  ;;  %v2171_v9 = vadd.f32 1.0, %v2893_v54 }
 0x256   :  { %v2897_v63 = vpop.eup %2896  ;;  %2922 = vrcp.f32 %v2186_v59  ;;  %v2173_v3 = vadd.f32 1.0, %v2895_v61 }
 0x257   :  { %v2899_v6 = vpop.eup %2898  ;;  %2924 = vrcp.f32 %v2171_v9  ;;  %v2172_v10 = vadd.f32 1.0, %v2897_v63 }
 0x258   :  { %v2901_v7 = vpop.eup %2900  ;;  %2926 = vrcp.f32 %v2173_v3  ;;  %v2174_v8 = vadd.f32 1.0, %v2899_v6 }
 0x259   :  { %v2903_v11 = vpop.eup %2902  ;;  %2928 = vrcp.f32 %v2172_v10  ;;  %v2187_v12 = vadd.f32 1.0, %v2901_v7 }
 0x25a   :  { %v2905_v13 = vpop.eup %2904  ;;  %2930 = vrcp.f32 %v2174_v8  ;;  %v2189_v14 = vadd.f32 1.0, %v2903_v11 }
 0x25b   :  { %v2907_v17 = vpop.eup %2906  ;;  %2932 = vrcp.f32 %v2187_v12  ;;  %v2188_v18 = vadd.f32 1.0, %v2905_v13 }
 0x25c   :  { %v2909_v19 = vpop.eup %2908  ;;  %2934 = vrcp.f32 %v2189_v14  ;;  %v2190_v20 = vadd.f32 1.0, %v2907_v17 }
 0x25d   :  { %v2911_v15 = vpop.eup %2910  ;;  %2263 = vst [vmem:[#allocation3 + $0x40] sm:$0xff] %v2909_v19  ;;  %2936 = vrcp.f32 %v2188_v18 }
 0x25e   :  { %v2913_v21 = vpop.eup %2912  ;;  %2265 = vst [vmem:[#allocation3 + $0x50] sm:$0xff] %v2911_v15  ;;  %2938 = vrcp.f32 %v2190_v20 }
 0x25f   :  { %v2915_v22 = vpop.eup %2914  ;;  %2264 = vst [vmem:[#allocation3 + $0x48] sm:$0xff] %v2913_v21 }
 0x260   :  { %v2917_v24 = vpop.eup %2916  ;;  %2266 = vst [vmem:[#allocation3 + $0x58] sm:$0xff] %v2915_v22 }
 0x261   :  { %v2919_v25 = vpop.eup %2918  ;;  %2279 = vst [vmem:[#allocation3 + $0xc0] sm:$0xff] %v2917_v24 }
 0x262   :  { %v2921_v55 = vpop.eup %2920  ;;  %2281 = vst [vmem:[#allocation3 + $0xd0] sm:$0xff] %v2919_v25 }
 0x263   :  { %v2923_v16 = vpop.eup %2922  ;;  %2280 = vst [vmem:[#allocation3 + $0xc8] sm:$0xff] %v2921_v55 }
 0x264   :  { %v2925_v23 = vpop.eup %2924  ;;  %2282 = vst [vmem:[#allocation3 + $0xd8] sm:$0xff] %v2923_v16 }
 0x265   :  { %v2927_v26 = vpop.eup %2926  ;;  %2267 = vst [vmem:[#allocation3 + $0x60] sm:$0xff] %v2925_v23 }
 0x266   :  { %v2929_v27 = vpop.eup %2928  ;;  %2269 = vst [vmem:[#allocation3 + $0x70] sm:$0xff] %v2927_v26 }
 0x267   :  { %v2931_v28 = vpop.eup %2930  ;;  %2268 = vst [vmem:[#allocation3 + $0x68] sm:$0xff] %v2929_v27 }
 0x268   :  { %v2933_v29 = vpop.eup %2932  ;;  %2270 = vst [vmem:[#allocation3 + $0x78] sm:$0xff] %v2931_v28 }
 0x269   :  { %v2935_v30 = vpop.eup %2934  ;;  %2283 = vst [vmem:[#allocation3 + $0xe0] sm:$0xff] %v2933_v29 }
 0x26a   :  { %v2937_v31 = vpop.eup %2936  ;;  %2285 = vst [vmem:[#allocation3 + $0xf0] sm:$0xff] %v2935_v30 }
 0x26b   :  { %v2939_v32 = vpop.eup %2938  ;;  %2284 = vst [vmem:[#allocation3 + $0xe8] sm:$0xff] %v2937_v31 }
 0x26c   :  { %2286 = vst [vmem:[#allocation3 + $0xf8] sm:$0xff] %v2939_v32 }
 0x26d   :  { %2951 = shalt.err (!%p2948_p4)
}
 0x26e   :  { %s2964_s26 = smov 2048   ;;  %s2965_s27 = smov 128  }
 0x26f   :  { %2298 = dma.vmem_to_hbm [thread:$0]  %s2293_s24, 4096, %s3691_s5, [#allocation4], %s2964_s26, %s2964_s26, %s2965_s27  }
 0x270   :  { %2960 = dma.done.wait [#allocation4], 4096  }
 0x271   :  { %2961 = vsyncadd [#allocation4], 4294963200 }
 0x272   :  { %2302 = vsyncpa [#allocation4], 1 }

</bundles_post_ra>
